<compile_context>
chip_gen: v5e
topology: v5e:2x2
jax: 0.10.0
libtpu: 0.0.40
codegen_flags: <defaults>
</compile_context>

<pallas_src>
import functools
import math

import numpy as np
import jax
import jax.numpy as jnp
from jax.experimental import pallas as pl
from jax.experimental.pallas import tpu as pltpu


# ----------------------------------------------------------------------------
# helpers
# ----------------------------------------------------------------------------
def _round_up(x, m):
    return ((x + m - 1) // m) * m


def _pad2(a, rows, cols):
    R, C = a.shape
    if R == rows and C == cols:
        return a
    return jnp.pad(a, ((0, rows - R), (0, cols - C)))


def _default_vmem_limit():
    # v5e/v6e: 128 MiB physical -> ~96 MiB budget; v7x: 64 MiB -> ~48 MiB.
    try:
        cap = pltpu.get_tpu_info().vmem_capacity_bytes
        return int(min(0.75 * cap, 96 * 1024 * 1024))
    except Exception:
        return 32 * 1024 * 1024


_VMEM_LIMIT = _default_vmem_limit()


def _pick_tile_m(M, pref):
    cap = _round_up(M, 8)
    tm = min(pref, cap)
    if tm == cap and M > 8:
        # Split into >=2 row blocks so both TensorCores (v7x) see parallel work
        # even when the N grid collapses to a single tile.
        tm = _round_up((M + 1) // 2, 8)
    Mp = _round_up(M, tm)
    return tm, Mp


def _pick_tile_lane(N, pref):
    # Lane (last) dim: always pad to a multiple of 128 so stores stay lane-dense
    # (no vst.msk partial stores), slice the padding off in the wrapper.
    Np = _round_up(N, 128)
    t = max(128, (min(pref, Np) // 128) * 128)
    while Np % t:
        t -= 128
    return t, Np


def _pick_tile_k(K, pref):
    if K < 128:
        return K, K          # block == full dim (allowed by the (8,128) rule)
    Kp = _round_up(K, 128)
    t = max(128, (min(pref, Kp) // 128) * 128)
    while Kp % t:
        t -= 128
    return t, Kp


# ----------------------------------------------------------------------------
# GELU (exact, erf variant) -- in-kernel if Mosaic can lower erf
# ----------------------------------------------------------------------------
def _gelu_erf(x):
    return 0.5 * x * (1.0 + jax.lax.erf(x * np.float32(1.0 / math.sqrt(2.0))))


def gelu_exact(x):
    # Plain-JAX fallback (matches torch nn.GELU(), erf variant).
    return 0.5 * x * (1.0 + jax.lax.erf(x * (1.0 / math.sqrt(2.0))))


_ERF_OK = None


def _erf_in_kernel_ok():
    """One-time probe: does erf lower inside a Mosaic kernel on this backend?"""
    global _ERF_OK
    if _ERF_OK is None:
        def k(x_ref, o_ref):
            o_ref[...] = _gelu_erf(x_ref[...])
        try:
            r = pl.pallas_call(
                k, out_shape=jax.ShapeDtypeStruct((8, 128), jnp.float32))(
                    jnp.zeros((8, 128), jnp.float32))
            jax.block_until_ready(r)
            _ERF_OK = True
        except Exception:
            _ERF_OK = False
    return _ERF_OK


# ----------------------------------------------------------------------------
# Pallas kernels
# ----------------------------------------------------------------------------
def _mm_kernel(x_ref, w_ref, o_ref, acc_ref):
    # Tiled matmul, K-axis accumulation. bf16 operands (w already bf16), f32 acc.
    @pl.when(pl.program_id(2) == 0)
    def _():
        acc_ref[...] = jnp.zeros_like(acc_ref)

    acc_ref[...] += jnp.dot(x_ref[...].astype(jnp.bfloat16), w_ref[...],
                            preferred_element_type=jnp.float32)

    @pl.when(pl.program_id(2) == pl.num_programs(2) - 1)
    def _():
        o_ref[...] = acc_ref[...].astype(o_ref.dtype)


def _mm_bias_kernel(x_ref, w_ref, b_ref, o_ref, acc_ref):
    @pl.when(pl.program_id(2) == 0)
    def _():
        acc_ref[...] = jnp.zeros_like(acc_ref)

    acc_ref[...] += jnp.dot(x_ref[...].astype(jnp.bfloat16), w_ref[...],
                            preferred_element_type=jnp.float32)

    @pl.when(pl.program_id(2) == pl.num_programs(2) - 1)
    def _():
        o_ref[...] = (acc_ref[...] + b_ref[...]).astype(o_ref.dtype)


def _mm_bias_res_kernel(x_ref, w_ref, b_ref, r_ref, o_ref, acc_ref):
    # Matmul with bias + fused residual add in the last-K epilogue.
    @pl.when(pl.program_id(2) == 0)
    def _():
        acc_ref[...] = jnp.zeros_like(acc_ref)

    acc_ref[...] += jnp.dot(x_ref[...].astype(jnp.bfloat16), w_ref[...],
                            preferred_element_type=jnp.float32)

    @pl.when(pl.program_id(2) == pl.num_programs(2) - 1)
    def _():
        o_ref[...] = (acc_ref[...] + b_ref[...] +
                      r_ref[...].astype(jnp.float32)).astype(o_ref.dtype)


def _ln_to_scratch(x_ref, g_ref, beta_ref, xn_ref):
    # PyTorch nn.LayerNorm semantics (biased variance, eps=1e-5), f32 stats.
    x = x_ref[...].astype(jnp.float32)
    mean = jnp.mean(x, axis=-1, keepdims=True)
    xc = x - mean
    var = jnp.mean(xc * xc, axis=-1, keepdims=True)
    xn = xc * jax.lax.rsqrt(var + 1e-5) * g_ref[...] + beta_ref[...]
    xn_ref[...] = xn.astype(xn_ref.dtype)


def _ln_mm_kernel(x_ref, g_ref, beta_ref, w_ref, o_ref, xn_ref):
    # Fused LayerNorm -> matmul (no bias). LN computed once per row tile
    # (j == 0) into a bf16 scratch and reused for every output tile.
    @pl.when(pl.program_id(1) == 0)
    def _():
        _ln_to_scratch(x_ref, g_ref, beta_ref, xn_ref)

    o_ref[...] = jnp.dot(xn_ref[...], w_ref[...],
                         preferred_element_type=jnp.float32).astype(o_ref.dtype)


def _ln_mm_bias_kernel(x_ref, g_ref, beta_ref, w_ref, b_ref, o_ref, xn_ref,
                       *, fuse_gelu):
    @pl.when(pl.program_id(1) == 0)
    def _():
        _ln_to_scratch(x_ref, g_ref, beta_ref, xn_ref)

    acc = jnp.dot(xn_ref[...], w_ref[...], preferred_element_type=jnp.float32)
    acc = acc + b_ref[...]
    if fuse_gelu:
        acc = _gelu_erf(acc)
    o_ref[...] = acc.astype(o_ref.dtype)


def _attention_kernel(qkv_ref, o_ref, *, num_heads, scale):
    # One batch element per grid step, all heads processed here.
    # qkv layout matches torch: columns [q(H*hd) | k(H*hd) | v(H*hd)],
    # head h occupies columns h*hd:(h+1)*hd within each third.
    # TODO(synk): for production sequence lengths add flash-style KV tiling
    #             (online softmax over a (B, H, q_tile, kv_tile) grid) so the
    #             (N, N) score tile never pressures v7x's 64 MiB VMEM.
    qkv = qkv_ref[0]                       # (N, 3D) f32
    D3 = qkv.shape[-1]
    D = D3 // 3
    hd = D // num_heads
    for h in range(num_heads):             # static unroll, static column slices
        q = (qkv[:, h * hd:(h + 1) * hd] * scale).astype(jnp.bfloat16)
        k = qkv[:, D + h * hd:D + (h + 1) * hd].astype(jnp.bfloat16)
        v = qkv[:, 2 * D + h * hd:2 * D + (h + 1) * hd].astype(jnp.bfloat16)
        # Contract the last dims of q and k -> no transposed copy of k.
        s = jax.lax.dot_general(q, k, (((1,), (1,)), ((), ())),
                                preferred_element_type=jnp.float32)   # (N, N)
        s = s - jnp.max(s, axis=-1, keepdims=True)
        p = jnp.exp(s)
        inv = pl.reciprocal(jnp.sum(p, axis=-1, keepdims=True), approx=True)
        o_h = jnp.dot(p.astype(jnp.bfloat16), v,
                      preferred_element_type=jnp.float32)             # (N, hd)
        # Deferred softmax normalization: scale the small (N, hd) output, not
        # the (N, N) probability matrix; write straight into the resident
        # output block (single writeback per batch element, no concatenate).
        o_ref[0, :, h * hd:(h + 1) * hd] = (o_h * inv).astype(o_ref.dtype)


# ----------------------------------------------------------------------------
# kernel wrappers
# ----------------------------------------------------------------------------
def matmul_bias(x, w, b=None, residual=None, *, tm=256, tn=256, tk=512):
    """x: (M, K) f32, w: (K, N) (cast to bf16), b: (N,)|None, residual: (M, N)|None."""
    M, K = x.shape
    K2, N = w.shape
    assert K == K2

    tm, Mp = _pick_tile_m(M, tm)
    tn, Np = _pick_tile_lane(N, tn)
    tk, Kp = _pick_tile_k(K, tk)

    xp = _pad2(x, Mp, Kp)
    wp = _pad2(w, Kp, Np).astype(jnp.bfloat16)
    grid = (Mp // tm, Np // tn, Kp // tk)

    x_spec = pl.BlockSpec((tm, tk), lambda i, j, k: (i, k))
    w_spec = pl.BlockSpec((tk, tn), lambda i, j, k: (k, j))
    common = dict(
        out_shape=jax.ShapeDtypeStruct((Mp, Np), x.dtype),
        grid=grid,
        out_specs=pl.BlockSpec((tm, tn), lambda i, j, k: (i, j)),
        scratch_shapes=[pltpu.VMEM((tm, tn), jnp.float32)],
        compiler_params=pltpu.CompilerParams(
            dimension_semantics=("parallel", "parallel", "arbitrary"),
            vmem_limit_bytes=_VMEM_LIMIT),
    )
    if b is None:
        assert residual is None
        out = pl.pallas_call(_mm_kernel, in_specs=[x_spec, w_spec],
                             **common)(xp, wp)
    else:
        bp = _pad2(jnp.reshape(b, (1, N)).astype(jnp.float32), 1, Np)
        b_spec = pl.BlockSpec((1, tn), lambda i, j, k: (0, j))
        if residual is None:
            out = pl.pallas_call(_mm_bias_kernel,
                                 in_specs=[x_spec, w_spec, b_spec],
                                 **common)(xp, wp, bp)
        else:
            rp = _pad2(residual, Mp, Np)
            r_spec = pl.BlockSpec((tm, tn), lambda i, j, k: (i, j))
            out = pl.pallas_call(_mm_bias_res_kernel,
                                 in_specs=[x_spec, w_spec, b_spec, r_spec],
                                 **common)(xp, wp, bp, rp)
    return out[:M, :N]


def layernorm_matmul(x, g, beta, w, b=None, *, gelu=False, tm=256, tn=256):
    """Fused LayerNorm(x) @ w (+ b) (+ GELU).  x: (M, K), w: (K, N).
    K (the normalized dim) is kept whole per block so LN stats are exact."""
    M, K = x.shape
    K2, N = w.shape
    assert K == K2
    fuse_gelu = bool(gelu) and _erf_in_kernel_ok()

    tm, Mp = _pick_tile_m(M, tm)
    tn, Np = _pick_tile_lane(N, tn)

    xp = _pad2(x, Mp, K)
    wp = _pad2(w, K, Np).astype(jnp.bfloat16)
    g2 = jnp.reshape(g, (1, K)).astype(jnp.float32)
    beta2 = jnp.reshape(beta, (1, K)).astype(jnp.float32)

    grid = (Mp // tm, Np // tn)
    x_spec = pl.BlockSpec((tm, K), lambda i, j: (i, 0))
    vec_spec = pl.BlockSpec((1, K), lambda i, j: (0, 0))
    w_spec = pl.BlockSpec((K, tn), lambda i, j: (0, j))
    out_spec = pl.BlockSpec((tm, tn), lambda i, j: (i, j))
    common = dict(
        out_shape=jax.ShapeDtypeStruct((Mp, Np), x.dtype),
        grid=grid,
        out_specs=out_spec,
        # bf16 LN scratch, computed once per row tile, reused for every j.
        scratch_shapes=[pltpu.VMEM((tm, K), jnp.bfloat16)],
        compiler_params=pltpu.CompilerParams(
            dimension_semantics=("parallel", "arbitrary"),
            vmem_limit_bytes=_VMEM_LIMIT),
    )
    if b is None:
        out = pl.pallas_call(_ln_mm_kernel,
                             in_specs=[x_spec, vec_spec, vec_spec, w_spec],
                             **common)(xp, g2, beta2, wp)
    else:
        bp = _pad2(jnp.reshape(b, (1, N)).astype(jnp.float32), 1, Np)
        b_spec = pl.BlockSpec((1, tn), lambda i, j: (0, j))
        out = pl.pallas_call(
            functools.partial(_ln_mm_bias_kernel, fuse_gelu=fuse_gelu),
            in_specs=[x_spec, vec_spec, vec_spec, w_spec, b_spec],
            **common)(xp, g2, beta2, wp, bp)
    out = out[:M, :N]
    if gelu and not fuse_gelu:
        out = gelu_exact(out)
    return out


def multihead_attention_core(qkv, num_heads):
    """qkv: (B, N, 3D) -> (B, N, D) softmax(QK^T)V with heads folded lane-dense."""
    B, N, D3 = qkv.shape
    D = D3 // 3
    hd = D // num_heads
    scale = hd ** -0.5
    return pl.pallas_call(
        functools.partial(_attention_kernel, num_heads=num_heads, scale=scale),
        out_shape=jax.ShapeDtypeStruct((B, N, D), qkv.dtype),
        grid=(B,),
        in_specs=[pl.BlockSpec((1, N, D3), lambda b: (b, 0, 0))],
        out_specs=pl.BlockSpec((1, N, D), lambda b: (b, 0, 0)),
        compiler_params=pltpu.CompilerParams(
            dimension_semantics=("parallel",),
            vmem_limit_bytes=_VMEM_LIMIT),
    )(qkv)


# ----------------------------------------------------------------------------
# Model pieces (glue)
# ----------------------------------------------------------------------------
def transformer_block(x, p, num_heads):
    # init_values=0.0 -> gamma_1/gamma_2 are None; drop rates 0 -> identity.
    B, N, D = x.shape
    x2 = x.reshape(B * N, D)

    # --- attention branch: fused LN1 -> qkv (no bias), attention, proj+resid ---
    qkv = layernorm_matmul(x2, p['norm1_g'], p['norm1_b'], p['qkv_w'])
    attn = multihead_attention_core(qkv.reshape(B, N, 3 * D), num_heads)
    x = matmul_bias(attn.reshape(B * N, D), p['proj_w'], p['proj_b'],
                    residual=x2).reshape(B, N, D)

    # --- MLP branch: fused LN2 -> fc1 (+bias, +GELU), fc2 (+bias, +residual) ---
    x2 = x.reshape(B * N, D)
    h = layernorm_matmul(x2, p['norm2_g'], p['norm2_b'],
                         p['fc1_w'], p['fc1_b'], gelu=True)
    x = matmul_bias(h, p['fc2_w'], p['fc2_b'], residual=x2).reshape(B, N, D)
    return x


def patch_embed(x, w, b, tubelet, patch):
    # Conv3d with kernel=stride=(tubelet, patch, patch) == patchify + matmul.
    B, C, T, H, W = x.shape
    tt, hh, ww = T // tubelet, H // patch, W // patch
    xp = x.reshape(B, C, tt, tubelet, hh, patch, ww, patch)
    xp = xp.transpose(0, 2, 4, 6, 1, 3, 5, 7)        # (B, tt, hh, ww, C, ts, p, p)
    xp = xp.reshape(B * tt * hh * ww, C * tubelet * patch * patch)
    E = w.shape[1]
    out = matmul_bias(xp, w, b)                      # (B*Np, E)
    return out.reshape(B, tt * hh * ww, E)


def get_sinusoid_encoding_table(n_position, d_hid):
    pos = np.arange(n_position, dtype=np.float64)[:, None]
    i = np.arange(d_hid, dtype=np.float64)[None, :]
    angle = pos / np.power(10000.0, 2.0 * (i // 2) / d_hid)
    table = np.zeros((n_position, d_hid), dtype=np.float32)
    table[:, 0::2] = np.sin(angle[:, 0::2])
    table[:, 1::2] = np.cos(angle[:, 1::2])
    return jnp.asarray(table)[None]                  # (1, n, d)


def gather_tokens(x, sel_mask):
    """Equivalent of torch `x[sel_mask].reshape(B, -1, C)` for a bool mask with
    the same number of True entries per row (selected positions kept in order).
    TODO(synk): uses host-side mask inspection; replace with scalar-prefetch
                indices / static n_vis before wrapping the forward in jax.jit."""
    B, Np, D = x.shape
    sel_np = np.asarray(sel_mask)
    n_sel = int(sel_np[0].sum())
    assert (sel_np.sum(axis=1) == n_sel).all()
    order = jnp.argsort(jnp.logical_not(sel_mask).astype(jnp.int32), axis=1,
                        stable=True)
    idx = order[:, :n_sel]
    return jnp.take_along_axis(x, idx[:, :, None], axis=1)


# ----------------------------------------------------------------------------
# Parameter initialization (deterministic, synthetic); weights stored as bf16
# ----------------------------------------------------------------------------
def xavier_uniform(key, fan_in, fan_out, dtype=jnp.bfloat16):
    bound = math.sqrt(6.0 / (fan_in + fan_out))
    w = jax.random.uniform(key, (fan_in, fan_out), jnp.float32, -bound, bound)
    return w.astype(dtype)


def init_block(key, dim, mlp_ratio):
    hidden = int(dim * mlp_ratio)
    k = jax.random.split(key, 4)
    f32 = jnp.float32
    return dict(
        norm1_g=jnp.ones((dim,), f32), norm1_b=jnp.zeros((dim,), f32),
        qkv_w=xavier_uniform(k[0], dim, 3 * dim),
        proj_w=xavier_uniform(k[1], dim, dim), proj_b=jnp.zeros((dim,), f32),
        norm2_g=jnp.ones((dim,), f32), norm2_b=jnp.zeros((dim,), f32),
        fc1_w=xavier_uniform(k[2], dim, hidden), fc1_b=jnp.zeros((hidden,), f32),
        fc2_w=xavier_uniform(k[3], hidden, dim), fc2_b=jnp.zeros((dim,), f32),
    )


def init_params(key, cfg):
    f32 = jnp.float32
    De, Dd = cfg['enc_dim'], cfg['dec_dim']
    K = cfg['in_chans'] * cfg['tubelet'] * cfg['patch'] ** 2
    keys = jax.random.split(key, 8 + cfg['enc_depth'] + cfg['dec_depth'])
    ki = iter(keys)

    conv_bound = 1.0 / math.sqrt(K)
    params = dict(
        patch_w=jax.random.uniform(next(ki), (K, De), f32, -conv_bound,
                                   conv_bound).astype(jnp.bfloat16),
        patch_b=jax.random.uniform(next(ki), (De,), f32, -conv_bound, conv_bound),
        enc_pos=get_sinusoid_encoding_table(cfg['num_patches'], De),
        enc_blocks=[init_block(next(ki), De, cfg['mlp_ratio'])
                    for _ in range(cfg['enc_depth'])],
        enc_norm_g=jnp.ones((De,), f32), enc_norm_b=jnp.zeros((De,), f32),
        e2d_w=xavier_uniform(next(ki), De, Dd),          # Linear, bias=False
        mask_token=0.02 * jax.random.truncated_normal(next(ki), -1.0, 1.0,
                                                      (1, 1, Dd), f32),
        dec_pos=get_sinusoid_encoding_table(cfg['num_patches'], Dd),
        dec_blocks=[init_block(next(ki), Dd, cfg['mlp_ratio'])
                    for _ in range(cfg['dec_depth'])],
        dec_norm_g=jnp.ones((Dd,), f32), dec_norm_b=jnp.zeros((Dd,), f32),
        head_w=xavier_uniform(next(ki), Dd, cfg['dec_num_classes']),
        head_b=jnp.zeros((cfg['dec_num_classes'],), f32),
    )
    return params


# ----------------------------------------------------------------------------
# Full forward (mcm=False path; drop/drop_path/attn_drop all 0 -> identity)
# ----------------------------------------------------------------------------
# TODO(synk): mcm_step (motion-centric masking) branch not implemented; only the
#             default mcm=False path of the reference forward is reproduced.
def pretrain_vit_forward(x, mask, params, cfg):
    B = x.shape[0]
    # ---- encoder ----
    tok = patch_embed(x, params['patch_w'], params['patch_b'],
                      cfg['tubelet'], cfg['patch'])               # (B, Np, De)
    # TODO(synk): fold the positional add into the patch-embed matmul epilogue
    #             (needs a pos input blocked modulo num_patches).
    tok = tok + params['enc_pos'].astype(tok.dtype)
    keep = jnp.logical_not(mask)
    x_vis = gather_tokens(tok, keep)                              # (B, Nvis, De)
    for bp in params['enc_blocks']:
        x_vis = transformer_block(x_vis, bp, cfg['enc_heads'])

    # ---- encoder norm (+ Identity head) fused with encoder_to_decoder ----
    Bv, Nv, De = x_vis.shape
    x_vis = layernorm_matmul(x_vis.reshape(Bv * Nv, De),
                             params['enc_norm_g'], params['enc_norm_b'],
                             params['e2d_w'])                     # bias=False
    Cd = x_vis.shape[-1]
    x_vis = x_vis.reshape(Bv, Nv, Cd)

    # ---- assemble decoder input ----
    pos = jnp.broadcast_to(params['dec_pos'].astype(x.dtype),
                           (B, cfg['num_patches'], Cd))
    pos_vis = gather_tokens(pos, keep)
    pos_msk = gather_tokens(pos, mask)
    x_full = jnp.concatenate(
        [x_vis + pos_vis, params['mask_token'] + pos_msk], axis=1)  # (B, Np, Cd)

    # ---- decoder ----
    xd = x_full
    for bp in params['dec_blocks']:
        xd = transformer_block(xd, bp, cfg['dec_heads'])
    n_ret = pos_msk.shape[1]
    xd = xd[:, -n_ret:]
    # decoder norm fused with decoder head
    Bd, Nd, Dd = xd.shape
    out = layernorm_matmul(xd.reshape(Bd * Nd, Dd),
                           params['dec_norm_g'], params['dec_norm_b'],
                           params['head_w'], params['head_b'])
    out = out.reshape(Bd, Nd, cfg['dec_num_classes'])
    return out, (None, None)


# ----------------------------------------------------------------------------
if __name__ == "__main__":
    # Small config consistent with the module's constraints:
    #   decoder_num_classes == 3 * tubelet * patch^2
    cfg = dict(
        img_size=16, patch=4, in_chans=3, frames=4, tubelet=2,
        enc_dim=32, enc_depth=2, enc_heads=4,
        dec_dim=32, dec_depth=2, dec_heads=4,
        mlp_ratio=4.0,
    )
    cfg['num_patches'] = (cfg['img_size'] // cfg['patch']) ** 2 * \
                         (cfg['frames'] // cfg['tubelet'])           # 32
    cfg['dec_num_classes'] = 3 * cfg['tubelet'] * cfg['patch'] ** 2  # 96

    key = jax.random.PRNGKey(0)
    kx, kmask, kparam = jax.random.split(key, 3)

    B = 2
    x = jax.random.normal(
        kx, (B, cfg['in_chans'], cfg['frames'], cfg['img_size'], cfg['img_size']),
        jnp.float32)

    # Boolean mask (True = masked), same count per row (masking ratio 0.75).
    n_vis = cfg['num_patches'] // 4                                  # 8 visible
    noise = jax.random.uniform(kmask, (B, cfg['num_patches']))
    rank = jnp.argsort(jnp.argsort(noise, axis=1), axis=1)
    mask = rank >= n_vis                                             # (B, 32) bool

    params = init_params(kparam, cfg)

    out, masks = pretrain_vit_forward(x, mask, params, cfg)
    out = jax.block_until_ready(out)

    n_masked = cfg['num_patches'] - n_vis
    assert out.shape == (B, n_masked, cfg['dec_num_classes']), out.shape
    assert bool(jnp.all(jnp.isfinite(out)))
    print("KERNEL_OK")
</pallas_src>

<mosaic_0001>
module attributes {stable_mosaic.version = 11 : i64} {
  func.func @_mm_bias_kernel(%arg0: i32, %arg1: i32, %arg2: i32, %arg3: memref<32x96xf32, #tpu.memory_space<vmem>>, %arg4: memref<96x128xbf16, #tpu.memory_space<vmem>>, %arg5: memref<1x128xf32, #tpu.memory_space<vmem>>, %arg6: memref<32x128xf32, #tpu.memory_space<vmem>>, %arg7: memref<32x128xf32, #tpu.memory_space<vmem>>) attributes {dimension_semantics = [#tpu.dimension_semantics<parallel>, #tpu.dimension_semantics<parallel>, #tpu.dimension_semantics<arbitrary>], iteration_bounds = array<i64: 2, 1, 1>, scalar_prefetch = 0 : i64, scratch_operands = 1 : i64, tpu.core_type = #tpu.core_type<tc>, window_params = [{transform_indices = @transform_0, window_bounds = array<i64: 32, 96>}, {transform_indices = @transform_1, window_bounds = array<i64: 96, 128>}, {transform_indices = @transform_2, window_bounds = array<i64: 1, 128>}, {transform_indices = @transform_3, window_bounds = array<i64: 32, 128>}]} {
    %c0_i32 = arith.constant 0 : i32
    %0 = arith.cmpi eq, %arg2, %c0_i32 : i32
    %1 = arith.extui %0 : i1 to i32
    %c0_i32_0 = arith.constant 0 : i32
    %2 = arith.cmpi ne, %1, %c0_i32_0 : i32
    scf.if %2 {
      %cst_10 = arith.constant 0.000000e+00 : f32
      %13 = vector.broadcast %cst_10 : f32 to vector<32x128xf32>
      %c0_11 = arith.constant 0 : index
      %c0_12 = arith.constant 0 : index
      %14 = vector.load %arg7[%c0_11, %c0_12] : memref<32x128xf32, #tpu.memory_space<vmem>>, vector<32x128xf32>
      tpu.vector_store %arg7[%c0_11, %c0_12], %13 {strides = array<i32>} : memref<32x128xf32, #tpu.memory_space<vmem>>, vector<32x128xf32>,
    } else {
    }
    %c0 = arith.constant 0 : index
    %c0_1 = arith.constant 0 : index
    %3 = vector.load %arg7[%c0, %c0_1] : memref<32x128xf32, #tpu.memory_space<vmem>>, vector<32x128xf32>
    %c0_2 = arith.constant 0 : index
    %c0_3 = arith.constant 0 : index
    %4 = vector.load %arg3[%c0_2, %c0_3] : memref<32x96xf32, #tpu.memory_space<vmem>>, vector<32x96xf32>
    %5 = arith.truncf %4 : vector<32x96xf32> to vector<32x96xbf16>
    %c0_4 = arith.constant 0 : index
    %c0_5 = arith.constant 0 : index
    %6 = vector.load %arg4[%c0_4, %c0_5] : memref<96x128xbf16, #tpu.memory_space<vmem>>, vector<96x128xbf16>
    %cst = arith.constant dense<0.000000e+00> : vector<32x128xf32>
    %7 = tpu.matmul %5, %6, %cst {dimension_numbers = #tpu.dot_dimension_numbers<[1], [0], [0], [1], [0, 0, 1, 1], [], []>} : vector<32x96xbf16>, vector<96x128xbf16>, vector<32x128xf32> -> vector<32x128xf32>
    %8 = arith.addf %3, %7 : vector<32x128xf32>
    %c0_6 = arith.constant 0 : index
    %c0_7 = arith.constant 0 : index
    %9 = vector.load %arg7[%c0_6, %c0_7] : memref<32x128xf32, #tpu.memory_space<vmem>>, vector<32x128xf32>
    tpu.vector_store %arg7[%c0_6, %c0_7], %8 {strides = array<i32>} : memref<32x128xf32, #tpu.memory_space<vmem>>, vector<32x128xf32>,
    %c0_i32_8 = arith.constant 0 : i32
    %10 = arith.cmpi eq, %arg2, %c0_i32_8 : i32
    %11 = arith.extui %10 : i1 to i32
    %c0_i32_9 = arith.constant 0 : i32
    %12 = arith.cmpi ne, %11, %c0_i32_9 : i32
    scf.if %12 {
      %c0_10 = arith.constant 0 : index
      %c0_11 = arith.constant 0 : index
      %13 = vector.load %arg7[%c0_10, %c0_11] : memref<32x128xf32, #tpu.memory_space<vmem>>, vector<32x128xf32>
      %c0_12 = arith.constant 0 : index
      %c0_13 = arith.constant 0 : index
      %14 = vector.load %arg5[%c0_12, %c0_13] : memref<1x128xf32, #tpu.memory_space<vmem>>, vector<1x128xf32>
      %15 = vector.broadcast %14 : vector<1x128xf32> to vector<32x128xf32>
      %16 = arith.addf %13, %15 : vector<32x128xf32>
      %c0_14 = arith.constant 0 : index
      %c0_15 = arith.constant 0 : index
      %17 = vector.load %arg6[%c0_14, %c0_15] : memref<32x128xf32, #tpu.memory_space<vmem>>, vector<32x128xf32>
      tpu.vector_store %arg6[%c0_14, %c0_15], %16 {strides = array<i32>} : memref<32x128xf32, #tpu.memory_space<vmem>>, vector<32x128xf32>,
    } else {
    }
    return
  }
  func.func @transform_0(%arg0: i32, %arg1: i32, %arg2: i32) -> (i32, i32) {
    %c0_i32 = arith.constant 0 : i32
    return %arg0, %arg2 : i32, i32
  }
  func.func @transform_1(%arg0: i32, %arg1: i32, %arg2: i32) -> (i32, i32) {
    %c0_i32 = arith.constant 0 : i32
    return %arg2, %arg1 : i32, i32
  }
  func.func @transform_2(%arg0: i32, %arg1: i32, %arg2: i32) -> (i32, i32) {
    %c0_i32 = arith.constant 0 : i32
    %c0_i32_0 = arith.constant 0 : i32
    return %c0_i32, %arg1 : i32, i32
  }
  func.func @transform_3(%arg0: i32, %arg1: i32, %arg2: i32) -> (i32, i32) {
    %c0_i32 = arith.constant 0 : i32
    return %arg0, %arg1 : i32, i32
  }
}

</mosaic_0001>

<bundles_post_ra>
// kernel: tpu_custom_call.1
= control target key start
LH: loop header
LB: loop body
LE: loop exit
PB: predicated region body
PF: predicated region fallthrough
CT: control target
= control target key end

     0   :  { %s980_s0 = inlined_call_operand.hbm [shape: f32[64,96], index: 0, kind: input, shape index: {}]   ;;  %s981_s1 = inlined_call_operand.hbm [shape: bf16[96,128], index: 1, kind: input, shape index: {}]   ;;  %s982_s2 = inlined_call_operand.vmem [shape: f32[1,128], index: 2, kind: input, shape index: {}]   ;;  %s983_s3 = inlined_call_operand.hbm [shape: f32[64,128], index: 3, kind: output, shape index: {}]  }
   0x1   :  { %984 = sst [smem:[#allocation12_spill]] %s981_s1 }
   0x2   :  { %8 = vsyncpa [#allocation4], 0 }
   0x3   :  { %10 = vsyncpa [#allocation4 + $0x1], 0 }
   0x4   :  { %11 = vsyncpa [#allocation7], 0 }
   0x5   :  { %12 = vsyncpa [#allocation5], 0 }
   0x6   :  { %14 = vsyncpa [#allocation5 + $0x1], 0  ;;  %s824_s12 = smov 0   ;;  %s826_s13 = smov 0  }
   0x7   :  { %s828_s14 = smov 0   ;;  %s830_s15 = smov 0  }
   0x8   :  { %s832_s16 = smov 0   ;;  %s834_s17 = smov 0  }
   0x9 LB: > { %s511_s18 = sadd.s32 4294967295, %s795_s17   ;;  %s512_s19 = sadd.s32 4294967294, %s795_s17   ;;  %s795_s17 = sphi %s834_s17, %s20_s17   ;;  %s791_s16 = sphi %s832_s16, %s997_s16   ;;  %s787_s15 = sphi %s830_s15, %s996_s15   ;;  %s783_s14 = sphi %s828_s14, %s995_s14   ;;  %s779_s13 = sphi %s826_s13, %s994_s13   ;;  %s775_s12 = sphi %s824_s12, %s993_s12  }
   0xa   : > { %p61_p0 = scmp.ne.s32.totalorder %s779_s13, %s775_s12  ;;  %p858_p1 = scmp.eq.s32.totalorder %s511_s18, 0 }
   0xb   : > { %p862_p2 = scmp.eq.s32.totalorder %s511_s18, 1  ;;  %p147_p3 = scmp.eq.s32.totalorder %s512_s19, 1 }
   0xc   : > { %p868_p4 = por %p858_p1, %p61_p0  ;;  %p513_p5 = scmp.ge.s32.totalorder %s795_s17, 1 }
   0xd   : > { %p873_p6 = por %p147_p3, %p61_p0  ;;  %p154_p7 = scmp.lt.s32.totalorder %s795_s17, 3 }
   0xe   : > { %s989_s1 = sld [smem:[#allocation12_spill]]  ;;  %s797_s28 = smov [#allocation6]  }
   0xf   : > { %p881_p8 = pnand %p513_p5, %p154_p7  ;;  %s171_s29 = sshll.u32 %s797_s28, 4  ;;  %s172_s29 = int_to_ptr.vmem [resolvable:$true] %s171_s29 }
  0x10   : > { %p516_p11 = scmp.ge.s32.totalorder %s795_s17, 2  ;;  %s798_s30 = smov 64  }
  0x11   : > { %p577_p9 = pneg %p881_p8  ;;  %s799_s4 = smov 4  }
  0x12   : > { %s39_s5 = sadd.s32 1, %s791_s16  ;;  %s48_s6 = sadd.s32 1, %s783_s14 }
  0x13   : > { %p578_p10 = pnand %p577_p9, %p858_p1  ;;  %p41_p12 = scmp.ge.s32.totalorder %s39_s5, 2 }
  0x14   : > { %s169_s26 = sshll.u32 %s989_s1, 4  ;;  %p55_p13 = scmp.ne.s32.totalorder %s783_s14, %s779_s13  ;;  %s170_s26 = int_to_ptr.hbm [resolvable:$true] %s169_s26 }
  0x15   : > { %580 = dma.hbm_to_vmem [thread:$0]  (!%p578_p10), %s170_s26, 768, %s172_s29, [#allocation7], %s798_s30, %s798_s30, %s799_s4  }
  0x16   : > { %p56_p0 = scmp.eq.s32.totalorder %s795_s17, 0  ;;  %s999_s5 = smov (%p41_p12, %s39_s5), 0 }
  0x17   : > { %p903_p5 = por %p862_p2, %p55_p13  ;;  %s43_s9 = ssub.s32 %s791_s16, %s999_s5 }
  0x18   : > { %p897_p3 = por %p56_p0, %p55_p13  ;;  %p590_p7 = scmp.lt.s32.totalorder %s795_s17, 2 }
  0x19   : > { %p46_p9 = scmp.eq.s32.totalorder %s43_s9, 0  ;;  %s191_s10 = sand.u32 1, %s783_s14  }
  0x1a   : > { %s517_s11 = sshll.u32 %s191_s10, 5  ;;  %s555_s19 = sshll.u32 %s791_s16, 5 }
  0x1b   : > { %s912_s18 = scalar_select %p46_p9, %s783_s14, %s48_s6  }
  0x1c   : > { %s201_s26 = scalar_lea.hbm %s980_s0, %s555_s19  ;;  %s195_s28 = scalar_lea.vmem [#allocation3], %s517_s11 }
  0x1d   : > { %s204_s29 = sshll.u32 %s195_s28, 4  ;;  %s202_s21 = sshll.u32 %s201_s26, 4  ;;  %s205_s29 = int_to_ptr.vmem [resolvable:$true] %s204_s29  ;;  %s203_s21 = int_to_ptr.hbm [resolvable:$true] %s202_s21 }
  0x1e   : > { %p582_p2 = pnand %p590_p7, %p897_p3  ;;  %s192_s30 = scalar_lea.sflag [#allocation4], %s191_s10 }
  0x1f   : > { %s800_s4 = smov 128   ;;  %s801_s1 = smov 8  }
  0x20   : > { %584 = dma.hbm_to_vmem [thread:$0]  (!%p582_p2), %s203_s21, 512, %s205_s29, %s192_s30, %s800_s4, %s800_s4, %s801_s1  }
  0x21   : > { %216 = sbr.rel (%p881_p8) target bundleno = 206 (0xce), region = 32  ;;  %s923_s6 = sand.u32 (!%p881_p8), 1, %s779_s13  }
  0x22   : > { %s521_s9 = sshll.u32 (!%p881_p8), %s923_s6, 5  ;;  %s219_s11 = scalar_lea.sflag (!%p881_p8), [#allocation4], %s923_s6 }
  0x23   : > { %s222_s19 = scalar_lea.vmem (!%p881_p8), [#allocation3], %s521_s9 }
  0x26   : > { %762 = dma.done.wait (%p868_p4), %s219_s11, 512  }
  0x27   : > { %764 = vsyncadd (%p868_p4), %s219_s11, 4294966784 }
  0x28   : > { %766 = dma.done.wait (%p858_p1), [#allocation7], 768  }
  0x29   : > { %768 = vsyncadd (%p858_p1), [#allocation7], 4294966528  ;;  %v561_v0 = vld [vmem:[#allocation6 + $0x28] sm:$0xff]  ;;  %v560_v1 = vld [vmem:[#allocation6 + $0x20] sm:$0xff]  ;;  %vm327_vm0 = vcmask 785408   ;;  %s562_s22 = sshll.u32 %s787_s15, 5 }
  0x2a   : > { %336 = vmatpush.bf16.msra.mxu0 %v561_v0  ;;  %563 = vmatpush.bf16.msra.mxu1 %v561_v0  ;;  %v559_v2 = vld [vmem:[#allocation6 + $0x18] sm:$0xff]  ;;  %v558_v3 = vld [vmem:[#allocation6 + $0x10] sm:$0xff]  ;;  %v557_v4 = vld [vmem:[#allocation6 + $0x8] sm:$0xff]  ;;  %s253_s27 = scalar_lea.vmem [#allocation8], %s521_s9  ;;  %s393_s24 = scalar_lea.hbm %s983_s3, %s562_s22 }
  0x2b   : > { %v556_v5 = vld [vmem:[#allocation6] sm:$0xff]  ;;  %v274_v7 = vld [vmem:[%s222_s19 + $0x8] sm:$0xff]  ;;  %v275_v8 = vld [vmem:[%s222_s19 + $0x10] sm:$0xff]  ;;  %s394_s25 = sshll.u32 %s253_s27, 4  ;;  %s396_s26 = sshll.u32 %s393_s24, 4  ;;  %s395_s25 = int_to_ptr.vmem [resolvable:$true] %s394_s25  ;;  %s397_s26 = int_to_ptr.hbm [resolvable:$true] %s396_s26 }
  0x2c   : > { %v273_v6 = vld [vmem:[%s222_s19] sm:$0xff]  ;;  %v276_v9 = vld [vmem:[%s222_s19 + $0x18] sm:$0xff]  ;;  %s381_s15 = scalar_lea.sflag [#allocation5], %s923_s6  ;;  %s723_s28 = sshra.s32 %s397_s26, 4  ;;  %s724_s28 = int_to_ptr.hbm [resolvable:$true] %s723_s28 }
  0x2d   : > { %v277_v10 = vpack.c.bf16 %v274_v7, %v273_v6  ;;  %v278_v11 = vpack.c.bf16 %v276_v9, %v275_v8  ;;  %v648_v12 = vld [vmem:[%s982_s2] ss:$0 sm:$0xff]  ;;  %s725_s29 = scalar_lea.hbm %s724_s28, 32  ;;  %s729_s4 = scalar_lea.hbm %s983_s3, 64 }
  0x2e   : > { %337 = vmatpush.bf16.msra.mxu0 %v560_v1  ;;  %564 = vmatpush.bf16.msra.mxu1 %v560_v1  ;;  %p726_p1 = scmp.ne.s32.totalorder %s724_s28, %s725_s29  ;;  %p730_p10 = scmp.lt.s32.totalorder %s724_s28, %s983_s3 }
  0x2f   : > { %p731_p12 = scmp.lt.s32.totalorder %s729_s4, %s725_s29 }
  0x30   : > { %p727_p4 = pnand %p726_p1, %p903_p5 }
  0x31   : > { %p732_p13 = por %p731_p12, %p730_p10 }
  0x32   : > { %338 = vmatpush.bf16.msra.mxu0 %v559_v2  ;;  %565 = vmatpush.bf16.msra.mxu1 %v559_v2  ;;  %p728_p8 = pneg %p727_p4 }
  0x34   : > { %p733_p0 = pnand %p732_p13, %p728_p8 }
  0x36   : > { %339 = vmatpush.bf16.msra.mxu0 %v558_v3  ;;  %566 = vmatpush.bf16.msra.mxu1 %v558_v3 }
  0x3a   : > { %340 = vmatpush.bf16.msra.mxu0 %v557_v4  ;;  %567 = vmatpush.bf16.msra.mxu1 %v557_v4 }
  0x3e   : > { %341 = vmatpush.bf16.msra.mxu0 %v556_v5  ;;  %568 = vmatpush.bf16.msra.mxu1 %v556_v5 }
  0x41   : > { %548 = vmatmul.msk.bf16.vlgmr.msra.gmra.mxu0 %vm327_vm0, %v277_v10  ;;  %549 = vmatmul.msk.bf16.vlgmr.msra.gmra.mxu1 %vm327_vm0, %v278_v11 }
  0xbe   : > { %v343_v13 = vpop.f32.mrf.mxu0  ;;  %v348_v14 = vpop.f32.mrf.mxu1 }
  0xbf   : > { %v372_v15 = vadd.f32 %v648_v12, %v343_v13  ;;  %v374_v16 = vadd.f32 %v648_v12, %v348_v14 }
  0xc1   : > { %376 = vst [vmem:[%s253_s27] sm:$0xff] %v372_v15 }
  0xc2   : > { %378 = vst [vmem:[%s253_s27 + $0x10] sm:$0xff] %v374_v16 }
  0xc6   : > { %v345_v17 = vpop.f32.mrf.mxu0  ;;  %v350_v18 = vpop.f32.mrf.mxu1 }
  0xc7   : > { %v373_v19 = vadd.f32 %v648_v12, %v345_v17  ;;  %v375_v20 = vadd.f32 %v648_v12, %v350_v18 }
  0xc9   : > { %377 = vst [vmem:[%s253_s27 + $0x8] sm:$0xff] %v373_v19 }
  0xca   : > { %379 = vst [vmem:[%s253_s27 + $0x18] sm:$0xff] %v375_v20 }
  0xcb   : > { %736 = shalt.err (!%p733_p0)
}
  0xcc   : > { %s802_s6 = smov 128   ;;  %s803_s19 = smov 8  }
  0xcd   : > { %575 = dma.vmem_to_hbm [thread:$0]  (%p903_p5), %s395_s25, 512, %s397_s26, %s381_s15, %s802_s6, %s802_s6, %s803_s19  }
  0xce PF: > { %s411_s1 = sand.u32 1, %s775_s12   ;;  %p586_p3 = pnand %p516_p11, %p873_p6 }
  0xcf   : > { %s412_s20 = scalar_lea.sflag [#allocation5], %s411_s1 }
  0xd0   : > { %p587_p7 = pneg %p586_p3 }
  0xd2   : > { %770 = dma.done.wait (%p587_p7), %s412_s20, 512  }
  0xd3   : > { %772 = vsyncadd (%p587_p7), %s412_s20, 4294966784  ;;  %s20_s17 = sadd.s32 1, %s795_s17   ;;  %s993_s12 = smov %s779_s13 }
  0xd4   : > { %p17_p9 = scmp.ge.s32.totalorder %s20_s17, 4   ;;  %s994_s13 = smov %s783_s14 }
  0xd5   : > { %s995_s14 = smov %s912_s18  ;;  %s996_s15 = smov %s791_s16 }
  0xd6   : > { %s997_s16 = smov %s999_s5  ;;  %19 = sbr.rel (!%p17_p9) target bundleno = 9 (0x9), region = 93 }
  0xdb   :  { %418 = vsyncpa [#allocation4], 1 }
  0xdc   :  { %420 = vsyncpa [#allocation4 + $0x1], 1 }
  0xdd   :  { %421 = vsyncpa [#allocation7], 1 }
  0xde   :  { %422 = vsyncpa [#allocation5], 1 }
  0xdf   :  { %424 = vsyncpa [#allocation5 + $0x1], 1 }

</bundles_post_ra>
